<compile_context>
chip_gen: v7x
topology: tpu7x:2x2x1
jax: 0.10.0
libtpu: 0.0.40
codegen_flags: <defaults>
</compile_context>

<pallas_src>
import jax
import jax.numpy as jnp
from jax.experimental import pallas as pl
from jax.experimental.pallas import tpu as pltpu

LANE = 128
SUBLANE = 8
CHUNK = LANE * SUBLANE          # 1024 elements = one (8,128) f32 vreg tile
MAX_TILE_ROWS = 8192            # (8192,128) f32 = 4 MiB per input per buffer


def _make_kernel(eps, tile_rows, tiles_per_core, tiles_total, tail_rows):
    # Plain Python float -> becomes an immediate in the kernel (no captured
    # traced constant, which is what broke the previous version).
    eps2 = float(eps) * float(eps)

    def compute(x_ref, y_ref):
        # cast to f32 in-kernel (inputs stream in native dtype, no wrapper upcast)
        d = x_ref[...].astype(jnp.float32) - y_ref[...].astype(jnp.float32)
        return jnp.sqrt(d * d + eps2)

    def fold(vals):
        # accumulate into the full (8,128) block: pure VPU adds across vregs,
        # no cross-sublane XLU reduce, 8x fewer addends per f32 accumulator elem
        return vals.reshape(tile_rows // SUBLANE, SUBLANE, LANE).sum(axis=0)

    def kernel(x_ref, y_ref, out_ref):
        c = pl.program_id(0)                 # TensorCore split axis ("parallel")
        i = pl.program_id(1)                 # reduction axis ("arbitrary")
        t = c * tiles_per_core + i           # global (unclamped) tile index

        @pl.when(i == 0)
        def _init():
            out_ref[...] = jnp.zeros_like(out_ref)

        if tail_rows:
            # interior tiles: no per-element mask at all
            @pl.when(t < tiles_total - 1)
            def _interior():
                out_ref[...] += fold(compute(x_ref, y_ref))

            # single tail tile: row mask only (last block overhangs the array;
            # OOB rows are undefined and zeroed out by the select)
            @pl.when(t == tiles_total - 1)
            def _tail():
                vals = compute(x_ref, y_ref)
                rows = jax.lax.broadcasted_iota(jnp.int32, (tile_rows, LANE), 0)
                out_ref[...] += fold(jnp.where(rows < tail_rows, vals, 0.0))
            # t >= tiles_total (clamped over-covering duplicate tile): skipped
        else:
            @pl.when(t < tiles_total)        # skips over-covering duplicates
            def _all():
                out_ref[...] += fold(compute(x_ref, y_ref))

    return kernel


def charbonnier_loss(x, y, eps=1e-3, *, max_tile_rows=MAX_TILE_ROWS):
    assert x.shape == y.shape, (x.shape, y.shape)
    assert max_tile_rows % SUBLANE == 0
    total = x.size
    assert total > 0
    eps2 = float(eps) * float(eps)

    xf = x.reshape(-1)
    yf = y.reshape(-1)

    aligned = (total // CHUNK) * CHUNK       # 1024-aligned prefix -> kernel
    tail = total - aligned                   # < 1024 ragged elements -> tiny XLA

    if tail:
        dt = xf[aligned:].astype(jnp.float32) - yf[aligned:].astype(jnp.float32)
        tail_sum = jnp.sum(jnp.sqrt(dt * dt + eps2))
    else:
        tail_sum = jnp.float32(0.0)

    if aligned == 0:
        # degenerate tiny input (< 1024 elements): nothing left for the kernel
        return tail_sum / jnp.float32(total)

    if aligned != total:                     # static branch: aligned inputs are
        xf = xf[:aligned]                    # fed untouched (no pad, no copy)
        yf = yf[:aligned]
    R = aligned // LANE                      # multiple of SUBLANE
    x2 = xf.reshape(R, LANE)
    y2 = yf.reshape(R, LANE)

    # ---- tiling + 2-TensorCore split (useful on v7x, harmless elsewhere) ----
    tile_rows = min(max_tile_rows, R)        # multiple of 8
    tiles_total = pl.cdiv(R, tile_rows)
    tail_rows = R % tile_rows                # valid rows in the last (overhanging) tile
    ncores = 2 if tiles_total >= 2 else 1
    tiles_per_core = pl.cdiv(tiles_total, ncores)

    def in_idx(c, i):
        t = c * tiles_per_core + i
        # Clamp so over-covering duplicate tiles never issue an OOB DMA;
        # the kernel skips their accumulation entirely via pl.when.
        return (jnp.minimum(t, tiles_total - 1), 0)

    kernel = _make_kernel(eps, tile_rows, tiles_per_core, tiles_total, tail_rows)

    partials = pl.pallas_call(
        kernel,
        out_shape=jax.ShapeDtypeStruct((ncores * SUBLANE, LANE), jnp.float32),
        grid_spec=pltpu.PrefetchScalarGridSpec(
            num_scalar_prefetch=0,
            grid=(ncores, tiles_per_core),
            in_specs=[
                pl.BlockSpec((tile_rows, LANE), in_idx),
                pl.BlockSpec((tile_rows, LANE), in_idx),
            ],
            out_specs=pl.BlockSpec((SUBLANE, LANE), lambda c, i: (c, 0)),
        ),
        compiler_params=pltpu.CompilerParams(
            dimension_semantics=("parallel", "arbitrary"),
            vmem_limit_bytes=48 * 1024 * 1024,
        ),
    )(x2, y2)

    # single tiny cross-lane reduce + mean over the TRUE element count
    return (jnp.sum(partials) + tail_sum) / jnp.float32(total)


if __name__ == "__main__":
    root = jax.random.PRNGKey(0)

    def ref_loss(x, y, eps):
        d = x.astype(jnp.float32) - y.astype(jnp.float32)
        return jnp.mean(jnp.sqrt(d * d + jnp.float32(float(eps) * float(eps))))

    checks = [
        # (shape, dtype, eps, max_tile_rows) -- small shapes covering each path
        ((2, 4, 16, 16), jnp.float32, 1e-3, MAX_TILE_ROWS),  # module-spec NCHW, aligned, 1 tile
        ((3, 5, 7, 11), jnp.float32, 2e-3, MAX_TILE_ROWS),   # ragged tail -> outside-kernel reduce
        ((2, 3, 20, 20), jnp.float32, 1e-3, 8),              # 2-core split, no tail tile
        ((5, 8, 128), jnp.float32, 1e-3, 16),                # tail-tile row mask + skipped dup tile
        ((4, 8, 16, 16), jnp.bfloat16, 1e-3, 16),            # native bf16 streaming, 2-core split
    ]
    for idx, (shape, dtype, eps, mtr) in enumerate(checks):
        kx, ky = jax.random.split(jax.random.fold_in(root, idx))
        x = jax.random.normal(kx, shape, dtype=jnp.float32).astype(dtype)
        y = jax.random.normal(ky, shape, dtype=jnp.float32).astype(dtype)

        got = jax.block_until_ready(
            charbonnier_loss(x, y, eps=eps, max_tile_rows=mtr))
        want = ref_loss(x, y, eps)
        assert jnp.allclose(got, want, rtol=1e-5, atol=1e-6), (shape, got, want)

    print("KERNEL_OK")
</pallas_src>

<mosaic_0001>
module attributes {stable_mosaic.version = 11 : i64} {
  func.func @kernel(%arg0: i32, %arg1: i32, %arg2: memref<16x128xf32, #tpu.memory_space<vmem>>, %arg3: memref<16x128xf32, #tpu.memory_space<vmem>>, %arg4: memref<8x128xf32, #tpu.memory_space<vmem>>) attributes {dimension_semantics = [#tpu.dimension_semantics<parallel>, #tpu.dimension_semantics<arbitrary>], iteration_bounds = array<i64: 1, 1>, scalar_prefetch = 0 : i64, scratch_operands = 0 : i64, tpu.core_type = #tpu.core_type<tc>, window_params = [{transform_indices = @transform_0, window_bounds = array<i64: 16, 128>}, {transform_indices = @transform_1, window_bounds = array<i64: 16, 128>}, {transform_indices = @transform_2, window_bounds = array<i64: 8, 128>}]} {
    %c1_i32 = arith.constant 1 : i32
    %0 = arith.muli %arg0, %c1_i32 : i32
    %1 = arith.addi %0, %arg1 : i32
    %c0_i32 = arith.constant 0 : i32
    %2 = arith.cmpi eq, %arg1, %c0_i32 : i32
    %3 = arith.extui %2 : i1 to i32
    %c0_i32_0 = arith.constant 0 : i32
    %4 = arith.cmpi ne, %3, %c0_i32_0 : i32
    scf.if %4 {
      %cst = arith.constant 0.000000e+00 : f32
      %8 = vector.broadcast %cst : f32 to vector<8x128xf32>
      %c0 = arith.constant 0 : index
      %c0_3 = arith.constant 0 : index
      %9 = vector.load %arg4[%c0, %c0_3] : memref<8x128xf32, #tpu.memory_space<vmem>>, vector<8x128xf32>
      tpu.vector_store %arg4[%c0, %c0_3], %8 {strides = array<i32>} : memref<8x128xf32, #tpu.memory_space<vmem>>, vector<8x128xf32>,
    } else {
    }
    %c1_i32_1 = arith.constant 1 : i32
    %5 = arith.cmpi slt, %1, %c1_i32_1 : i32
    %6 = arith.extui %5 : i1 to i32
    %c0_i32_2 = arith.constant 0 : i32
    %7 = arith.cmpi ne, %6, %c0_i32_2 : i32
    scf.if %7 {
      %c0 = arith.constant 0 : index
      %c0_3 = arith.constant 0 : index
      %8 = vector.load %arg4[%c0, %c0_3] : memref<8x128xf32, #tpu.memory_space<vmem>>, vector<8x128xf32>
      %c0_4 = arith.constant 0 : index
      %c0_5 = arith.constant 0 : index
      %9 = vector.load %arg2[%c0_4, %c0_5] : memref<16x128xf32, #tpu.memory_space<vmem>>, vector<16x128xf32>
      %c0_6 = arith.constant 0 : index
      %c0_7 = arith.constant 0 : index
      %10 = vector.load %arg3[%c0_6, %c0_7] : memref<16x128xf32, #tpu.memory_space<vmem>>, vector<16x128xf32>
      %11 = arith.subf %9, %10 : vector<16x128xf32>
      %12 = arith.mulf %11, %11 : vector<16x128xf32>
      %cst = arith.constant 9.99999997E-7 : f32
      %13 = vector.broadcast %cst : f32 to vector<16x128xf32>
      %14 = arith.addf %12, %13 : vector<16x128xf32>
      %15 = math.sqrt %14 : vector<16x128xf32>
      %16 = vector.shape_cast %15 : vector<16x128xf32> to vector<2x8x128xf32>
      %cst_8 = arith.constant dense<0.000000e+00> : vector<8x128xf32>
      %17 = vector.multi_reduction <add>, %16, %cst_8 [0] : vector<2x8x128xf32> to vector<8x128xf32>
      %18 = arith.addf %8, %17 : vector<8x128xf32>
      %c0_9 = arith.constant 0 : index
      %c0_10 = arith.constant 0 : index
      %19 = vector.load %arg4[%c0_9, %c0_10] : memref<8x128xf32, #tpu.memory_space<vmem>>, vector<8x128xf32>
      tpu.vector_store %arg4[%c0_9, %c0_10], %18 {strides = array<i32>} : memref<8x128xf32, #tpu.memory_space<vmem>>, vector<8x128xf32>,
    } else {
    }
    return
  }
  func.func @transform_0(%arg0: i32, %arg1: i32) -> (i32, i32) {
    %c1_i32 = arith.constant 1 : i32
    %0 = arith.muli %arg0, %c1_i32 : i32
    %1 = arith.addi %0, %arg1 : i32
    %c0_i32 = arith.constant 0 : i32
    %2 = arith.minsi %1, %c0_i32 : i32
    %c0_i32_0 = arith.constant 0 : i32
    %c0_i32_1 = arith.constant 0 : i32
    return %2, %c0_i32_0 : i32, i32
  }
  func.func @transform_1(%arg0: i32, %arg1: i32) -> (i32, i32) {
    %c1_i32 = arith.constant 1 : i32
    %0 = arith.muli %arg0, %c1_i32 : i32
    %1 = arith.addi %0, %arg1 : i32
    %c0_i32 = arith.constant 0 : i32
    %2 = arith.minsi %1, %c0_i32 : i32
    %c0_i32_0 = arith.constant 0 : i32
    %c0_i32_1 = arith.constant 0 : i32
    return %2, %c0_i32_0 : i32, i32
  }
  func.func @transform_2(%arg0: i32, %arg1: i32) -> (i32, i32) {
    %c0_i32 = arith.constant 0 : i32
    %c0_i32_0 = arith.constant 0 : i32
    return %arg0, %c0_i32 : i32, i32
  }
}

</mosaic_0001>

<bundles_post_ra>
// kernel: tpu_custom_call.1
= control target key start
LH: loop header
LB: loop body
LE: loop exit
PB: predicated region body
PF: predicated region fallthrough
CT: control target
= control target key end

     0   :  { %7 = vsyncpa [#allocation3], 0  ;;  %s256_s0 = inlined_call_operand.hbm [shape: f32[16,128], index: 0, kind: input, shape index: {}]   ;;  %s257_s1 = inlined_call_operand.hbm [shape: f32[16,128], index: 1, kind: input, shape index: {}]   ;;  %s258_s2 = inlined_call_operand.hbm [shape: f32[8,128], index: 2, kind: output, shape index: {}]  }
   0x1   :  { %8 = vsyncpa [#allocation6], 0 }
   0x2   :  { %9 = vsyncpa [#allocation4], 0  ;;  %s200_s9 = smov [#allocation2]   ;;  %s128_s13 = scalar_lea.hbm %s256_s0, 256 }
   0x3   :  { %s21_s10 = sshll.u32 %s200_s9, 4  ;;  %p129_p0 = scmp.ne.s32.totalorder %s256_s0, %s128_s13  ;;  %s22_s10 = int_to_ptr.vmem [resolvable:$true] %s21_s10 }
   0x4   :  { %p132_p1 = scmp.lt.u32.totalorder %s128_s13, %s256_s0 }
   0x6   :  { %p134_p2 = pnand %p132_p1, %p129_p0 }
   0x8   :  { %137 = shalt.err (!%p134_p2)
}
   0x9   :  { %s138_s18 = scalar_lea.vmem %s22_s10, 256  ;;  %p143_p4 = scmp.lt.s32.totalorder %s22_s10, %s22_s10 }
   0xa   :  { %p139_p3 = scmp.ne.s32.totalorder %s22_s10, %s138_s18  ;;  %p144_p5 = scmp.lt.s32.totalorder %s138_s18, %s138_s18 }
   0xc   :  { %p145_p6 = por %p144_p5, %p143_p4 }
   0xe   :  { %p146_p7 = pnand %p145_p6, %p139_p3 }
  0x10   :  { %149 = shalt.err (!%p146_p7)
}
  0x11   :  { %s201_s19 = smov 128   ;;  %s202_s20 = smov 8  }
  0x12   :  { %27 = dma.hbm_to_vmem [thread:$0]  %s256_s0, 256, %s22_s10, [#allocation3], %s201_s19, %s201_s19, %s202_s20  }
  0x13   :  { %s203_s23 = smov [#allocation5]   ;;  %s150_s27 = scalar_lea.hbm %s257_s1, 256 }
  0x14   :  { %s39_s24 = sshll.u32 %s203_s23, 4  ;;  %p151_p8 = scmp.ne.s32.totalorder %s257_s1, %s150_s27  ;;  %s40_s24 = int_to_ptr.vmem [resolvable:$true] %s39_s24 }
  0x15   :  { %p154_p9 = scmp.lt.u32.totalorder %s150_s27, %s257_s1 }
  0x17   :  { %p156_p10 = pnand %p154_p9, %p151_p8 }
  0x19   :  { %159 = shalt.err (!%p156_p10)
}
  0x1a   :  { %s160_s4 = scalar_lea.vmem %s40_s24, 256  ;;  %p165_p12 = scmp.lt.s32.totalorder %s40_s24, %s40_s24 }
  0x1b   :  { %p161_p11 = scmp.ne.s32.totalorder %s40_s24, %s160_s4  ;;  %p166_p13 = scmp.lt.s32.totalorder %s160_s4, %s160_s4 }
  0x1d   :  { %p167_p0 = por %p166_p13, %p165_p12 }
  0x1f   :  { %p168_p1 = pnand %p167_p0, %p161_p11 }
  0x21   :  { %171 = shalt.err (!%p168_p1)
}
  0x22   :  { %45 = dma.hbm_to_vmem [thread:$0]  %s257_s1, 256, %s40_s24, [#allocation6], %s201_s19, %s201_s19, %s202_s20  }
  0x23   :  { %194 = dma.done.wait [#allocation3], 256  }
  0x24   :  { %195 = vsyncadd [#allocation3], 4294967040 }
  0x25   :  { %196 = dma.done.wait [#allocation6], 256  }
  0x26   :  { %197 = vsyncadd [#allocation6], 4294967040  ;;  %v71_v0 = vld [vmem:[#allocation2] sm:$0xff]  ;;  %v72_v1 = vld [vmem:[#allocation2 + $0x8] sm:$0xff]  ;;  %s204_s1 = smov [#allocation7]  }
  0x27   :  { %v73_v2 = vld [vmem:[#allocation5] sm:$0xff]  ;;  %v74_v3 = vld [vmem:[#allocation5 + $0x8] sm:$0xff]  ;;  %s104_s6 = sshll.u32 %s204_s1, 4  ;;  %s105_s6 = int_to_ptr.vmem [resolvable:$true] %s104_s6 }
  0x28   :  { %v75_v4 = vsub.f32 %v71_v0, %v73_v2  ;;  %v76_v5 = vsub.f32 %v72_v1, %v74_v3  ;;  %s172_s7 = scalar_lea.vmem %s105_s6, 128  ;;  %p177_p3 = scmp.lt.s32.totalorder %s105_s6, %s105_s6 }
  0x29   :  { %p173_p2 = scmp.ne.s32.totalorder %s105_s6, %s172_s7  ;;  %p178_p4 = scmp.lt.s32.totalorder %s172_s7, %s172_s7 }
  0x2a   :  { %v77_v6 = vmul.f32 %v75_v4, %v75_v4  ;;  %v78_v7 = vmul.f32 %v76_v5, %v76_v5 }
  0x2b   :  { %p179_p5 = por %p178_p4, %p177_p3 }
  0x2c   :  { %v79_v8 = vadd.f32 1e-06, %v77_v6  ;;  %v80_v9 = vadd.f32 1e-06, %v78_v7 }
  0x2d   :  { %p180_p6 = pnand %p179_p5, %p173_p2 }
  0x2e   :  { %124 = vrsqrt.f32 %v79_v8  ;;  %vm83_vm0 = vcmp.eq.f32.partialorder %v79_v8, inf  ;;  %v86_v11 = vand.u32 2147483648, %v79_v8  ;;  %vm85_vm1 = vcmp.eq.f32.partialorder %v79_v8, 0.0 }
  0x2f   :  { %126 = vrsqrt.f32 %v80_v9  ;;  %vm90_vm2 = vcmp.eq.f32.partialorder %v80_v9, inf  ;;  %v93_v14 = vand.u32 2147483648, %v80_v9  ;;  %vm92_vm3 = vcmp.eq.f32.partialorder %v80_v9, 0.0 }
  0x38   :  { %v125_v10 = vpop.eup %124 }
  0x39   :  { %v127_v12 = vpop.eup %126  ;;  %v82_v13 = vmul.f32 %v125_v10, %v79_v8 }
  0x3a   :  { %v89_v15 = vmul.f32 %v127_v12, %v80_v9 }
  0x3b   :  { %v84_v16 = vsel %vm83_vm0, %v79_v8, %v82_v13 }
  0x3c   :  { %v87_v17 = vsel %vm85_vm1, %v86_v11, %v84_v16  ;;  %v91_v18 = vsel %vm90_vm2, %v80_v9, %v89_v15 }
  0x3d   :  { %v94_v19 = vsel %vm92_vm3, %v93_v14, %v91_v18 }
  0x3e   :  { %v95_v20 = vadd.f32 %v94_v19, %v87_v17 }
  0x40   :  { %97 = vst [vmem:[#allocation7] sm:$0xff] %v95_v20 }
  0x41   :  { %183 = shalt.err (!%p180_p6)
}
  0x42   :  { %s184_s10 = scalar_lea.hbm %s258_s2, 128 }
  0x43   :  { %p185_p7 = scmp.ne.s32.totalorder %s258_s2, %s184_s10  ;;  %p188_p8 = scmp.lt.u32.totalorder %s184_s10, %s258_s2 }
  0x45   :  { %p190_p9 = pnand %p188_p8, %p185_p7 }
  0x47   :  { %193 = shalt.err (!%p190_p9)
}
  0x48   :  { %107 = dma.vmem_to_hbm [thread:$0]  %s105_s6, 128, %s258_s2, [#allocation4]  }
  0x49   :  { %198 = dma.done.wait [#allocation4], 128  }
  0x4a   :  { %199 = vsyncadd [#allocation4], 4294967168 }
  0x4b   :  { %111 = vsyncpa [#allocation3], 1 }
  0x4c   :  { %112 = vsyncpa [#allocation6], 1 }
  0x4d   :  { %113 = vsyncpa [#allocation4], 1 }

</bundles_post_ra>
